<compile_context>
chip_gen: v7x
topology: tpu7x:2x2x1
jax: 0.10.0
libtpu: 0.0.40
codegen_flags: <defaults>
</compile_context>

<pallas_src>
import functools

import numpy as np
import jax
import jax.numpy as jnp
from jax import lax
from jax.experimental import pallas as pl
from jax.experimental.pallas import tpu as pltpu  # noqa: F401


def _round_up8(x):
    return (x + 7) // 8 * 8


# ----------------------------------------------------------------------------
# Init-time packing of all parameters into one [rows, D] f32 buffer.
# Layout (row ranges, each 8-row aligned):
#   pe : [0, max_len)          w1 : [off_w1, off_w1+D)    w2 : [off_w2, off_w2+D)
#   b1 : [off_b1, off_b1+1)    b2 : [off_b2, off_b2+1)
# ----------------------------------------------------------------------------
def pack_params(pe2d, w1, b1, w2, b2):
    max_len, d = pe2d.shape
    off_w1 = _round_up8(max_len)
    off_w2 = _round_up8(off_w1 + d)
    off_b1 = _round_up8(off_w2 + d)
    off_b2 = off_b1 + 8
    total = off_b2 + 8
    packed = jnp.zeros((total, d), jnp.float32)
    packed = packed.at[0:max_len].set(pe2d.astype(jnp.float32))
    packed = packed.at[off_w1:off_w1 + d].set(w1.astype(jnp.float32))
    packed = packed.at[off_w2:off_w2 + d].set(w2.astype(jnp.float32))
    packed = packed.at[off_b1:off_b1 + 1].set(b1.reshape(1, d).astype(jnp.float32))
    packed = packed.at[off_b2:off_b2 + 1].set(b2.reshape(1, d).astype(jnp.float32))
    layout = dict(max_len=max_len, d=d, off_w1=off_w1, off_w2=off_w2,
                  off_b1=off_b1, off_b2=off_b2)
    return packed, layout


# ----------------------------------------------------------------------------
# Fused kernel: pe-gather (one-hot MXU matmul) + Linear + SiLU + Linear.
#   ts     : [B, 1]      int32
#   params : [rows, D]   f32   (packed pe/w1/w2/b1/b2)
#   out    : [B, D]      f32   (the [1, B, D] permute is wrapper-side metadata)
# ----------------------------------------------------------------------------
def _timestep_embed_kernel(ts_ref, params_ref, o_ref, *,
                           max_len, d, off_w1, off_w2, off_b1, off_b2):
    # Static slices of the packed VMEM buffer (free ref views / aligned loads).
    pe = params_ref[0:max_len, :]
    w1 = params_ref[off_w1:off_w1 + d, :]
    w2 = params_ref[off_w2:off_w2 + d, :]
    b1 = params_ref[off_b1:off_b1 + 1, :]
    b2 = params_ref[off_b2:off_b2 + 1, :]

    B = ts_ref.shape[0]
    # Clamp indices (no runtime OOB check on VMEM; mirrors XLA gather clamping).
    ts = jnp.clip(ts_ref[...], 0, max_len - 1)                        # [B, 1]

    # Fused gather as a one-hot matmul on the MXU: x[b, :] = pe[ts[b], :].
    iota = lax.broadcasted_iota(jnp.int32, (B, max_len), 1)
    onehot = (ts == iota).astype(jnp.float32)                         # [B, max_len]
    x = jnp.dot(onehot, pe, preferred_element_type=jnp.float32)       # [B, D]

    # Two-layer MLP with SiLU (f32 throughout; exact on all generations).
    h = jnp.dot(x, w1, preferred_element_type=jnp.float32) + b1
    h = h * jax.nn.sigmoid(h)                                         # SiLU (EUP)
    y = jnp.dot(h, w2, preferred_element_type=jnp.float32) + b2

    o_ref[...] = y.astype(o_ref.dtype)


def timestep_embedder_forward(timesteps, packed, layout):
    """Module-faithful forward: gather + 2-layer MLP fused in one kernel.

    timesteps: [B] integer array
    packed:    [rows, D] f32 buffer from pack_params()
    returns:   [1, B, D]
    """
    max_len, d = layout["max_len"], layout["d"]
    B = timesteps.shape[0]
    ts2d = timesteps.reshape(B, 1).astype(jnp.int32)
    n_rows = packed.shape[0]

    kernel = functools.partial(_timestep_embed_kernel, **layout)
    full = lambda shape: pl.BlockSpec(shape, lambda: (0,) * len(shape))

    flops = 2 * B * (max_len * d + 2 * d * d) + 4 * B * d
    bytes_accessed = ts2d.size * 4 + packed.size * 4 + B * d * 4
    out2d = pl.pallas_call(
        kernel,
        out_shape=jax.ShapeDtypeStruct((B, d), packed.dtype),
        in_specs=[full((B, 1)), full((n_rows, d))],
        out_specs=full((B, d)),
        cost_estimate=pl.CostEstimate(flops=flops,
                                      transcendentals=B * d,
                                      bytes_accessed=bytes_accessed),
    )(ts2d, packed)

    # permute(1, 0, 2) of the [B, 1, D] result -> [1, B, D]; metadata-only.
    return out2d.reshape(1, B, d)


# ----------------------------------------------------------------------------
# Frozen-weight fast path: precompute MLP(pe) once at init, then forward() is
# a single one-hot-matmul gather.  Row-wise identical to gather-then-MLP.
# ----------------------------------------------------------------------------
def precompute_time_embed_table(pe2d, w1, b1, w2, b2):
    h = pe2d @ w1 + b1.reshape(1, -1)
    h = h * jax.nn.sigmoid(h)
    return h @ w2 + b2.reshape(1, -1)                                 # [max_len, D]


def _gather_kernel(ts_ref, table_ref, o_ref):
    max_len = table_ref.shape[0]
    B = ts_ref.shape[0]
    ts = jnp.clip(ts_ref[...], 0, max_len - 1)
    iota = lax.broadcasted_iota(jnp.int32, (B, max_len), 1)
    onehot = (ts == iota).astype(jnp.float32)
    o_ref[...] = jnp.dot(onehot, table_ref[...],
                         preferred_element_type=jnp.float32).astype(o_ref.dtype)


def timestep_embedder_forward_precomputed(timesteps, table):
    max_len, d = table.shape
    B = timesteps.shape[0]
    ts2d = timesteps.reshape(B, 1).astype(jnp.int32)
    full = lambda shape: pl.BlockSpec(shape, lambda: (0,) * len(shape))
    out2d = pl.pallas_call(
        _gather_kernel,
        out_shape=jax.ShapeDtypeStruct((B, d), table.dtype),
        in_specs=[full((B, 1)), full((max_len, d))],
        out_specs=full((B, d)),
        cost_estimate=pl.CostEstimate(flops=2 * B * max_len * d,
                                      transcendentals=0,
                                      bytes_accessed=(B + max_len * d + B * d) * 4),
    )(ts2d, table)
    return out2d.reshape(1, B, d)


# ----------------------------------------------------------------------------
# Host-side construction of the sinusoidal pe table (init-time, not hot path).
# ----------------------------------------------------------------------------
def make_sinusoidal_pe(max_len, d_model, dtype=jnp.float32):
    """Standard PositionalEncoding.pe with shape [max_len, 1, d_model]."""
    position = np.arange(max_len)[:, None].astype(np.float64)
    div_term = np.exp(np.arange(0, d_model, 2).astype(np.float64)
                      * (-np.log(10000.0) / d_model))
    pe = np.zeros((max_len, d_model), dtype=np.float64)
    pe[:, 0::2] = np.sin(position * div_term)
    pe[:, 1::2] = np.cos(position * div_term)
    return jnp.asarray(pe[:, None, :], dtype=dtype)  # [max_len, 1, d_model]


if __name__ == "__main__":
    latent_dim = 32        # D (time_embed_dim == latent_dim)
    max_len = 64
    batch = 8

    # Deterministic parameter init (shapes from nn.Linear(D, D) x2).
    key = jax.random.PRNGKey(0)
    k1, k2, k3, k4, kt = jax.random.split(key, 5)
    scale = 1.0 / np.sqrt(latent_dim)
    # Stored as [in, out] so the kernel does x @ W.  (Real PyTorch nn.Linear
    # checkpoints are [out, in]; transpose at load time when integrating.)
    w1 = jax.random.uniform(k1, (latent_dim, latent_dim), jnp.float32, -scale, scale)
    b1 = jax.random.uniform(k2, (1, latent_dim), jnp.float32, -scale, scale)
    w2 = jax.random.uniform(k3, (latent_dim, latent_dim), jnp.float32, -scale, scale)
    b2 = jax.random.uniform(k4, (1, latent_dim), jnp.float32, -scale, scale)

    pe = make_sinusoidal_pe(max_len, latent_dim)          # [max_len, 1, D]
    pe2d = pe.reshape(max_len, latent_dim)
    timesteps = jax.random.randint(kt, (batch,), 0, max_len, dtype=jnp.int32)

    # --- init-time packing (outside the per-step hot path) -------------------
    packed, layout = pack_params(pe2d, w1, b1, w2, b2)

    # --- module-faithful fused forward ---------------------------------------
    out = timestep_embedder_forward(timesteps, packed, layout)
    out = jax.block_until_ready(out)

    # --- frozen-weight fast path ---------------------------------------------
    table = precompute_time_embed_table(pe2d, w1, b1, w2, b2)  # once, at init
    out_fast = timestep_embedder_forward_precomputed(timesteps, table)
    out_fast = jax.block_until_ready(out_fast)

    # Reference check in plain JAX.
    def silu(x):
        return x * jax.nn.sigmoid(x)

    x_ref = pe[timesteps].reshape(batch, latent_dim)
    ref = (silu(x_ref @ w1 + b1) @ w2 + b2).reshape(batch, 1, latent_dim)
    ref = jnp.transpose(ref, (1, 0, 2))

    assert out.shape == (1, batch, latent_dim), out.shape
    assert out_fast.shape == (1, batch, latent_dim), out_fast.shape
    np.testing.assert_allclose(np.asarray(out), np.asarray(ref), rtol=1e-5, atol=1e-5)
    np.testing.assert_allclose(np.asarray(out_fast), np.asarray(ref), rtol=1e-4, atol=1e-5)
    print("KERNEL_OK")
</pallas_src>

<mosaic_0001>
module attributes {stable_mosaic.version = 11 : i64} {
  func.func @_timestep_embed_kernel(%arg0: memref<8x1xi32, #tpu.memory_space<vmem>>, %arg1: memref<144x32xf32, #tpu.memory_space<vmem>>, %arg2: memref<8x32xf32, #tpu.memory_space<vmem>>) attributes {dimension_semantics = [], scalar_prefetch = 0 : i64, scratch_operands = 0 : i64, tpu.core_type = #tpu.core_type<tc>} {
    %c0 = arith.constant 0 : index
    %c0_0 = arith.constant 0 : index
    %0 = vector.load %arg1[%c0, %c0_0] : memref<144x32xf32, #tpu.memory_space<vmem>>, vector<64x32xf32>
    %c64 = arith.constant 64 : index
    %c0_1 = arith.constant 0 : index
    %1 = vector.load %arg1[%c64, %c0_1] : memref<144x32xf32, #tpu.memory_space<vmem>>, vector<32x32xf32>
    %c96 = arith.constant 96 : index
    %c0_2 = arith.constant 0 : index
    %2 = vector.load %arg1[%c96, %c0_2] : memref<144x32xf32, #tpu.memory_space<vmem>>, vector<32x32xf32>
    %c128 = arith.constant 128 : index
    %c0_3 = arith.constant 0 : index
    %3 = vector.load %arg1[%c128, %c0_3] : memref<144x32xf32, #tpu.memory_space<vmem>>, vector<1x32xf32>
    %c136 = arith.constant 136 : index
    %c0_4 = arith.constant 0 : index
    %4 = vector.load %arg1[%c136, %c0_4] : memref<144x32xf32, #tpu.memory_space<vmem>>, vector<1x32xf32>
    %c0_5 = arith.constant 0 : index
    %c0_6 = arith.constant 0 : index
    %5 = vector.load %arg0[%c0_5, %c0_6] : memref<8x1xi32, #tpu.memory_space<vmem>>, vector<8x1xi32>
    %c0_i32 = arith.constant 0 : i32
    %c63_i32 = arith.constant 63 : i32
    %6 = vector.broadcast %c0_i32 : i32 to vector<8x1xi32>
    %7 = arith.maxsi %6, %5 : vector<8x1xi32>
    %8 = vector.broadcast %c63_i32 : i32 to vector<8x1xi32>
    %9 = arith.minsi %8, %7 : vector<8x1xi32>
    %10 = tpu.iota {dimensions = array<i32: 1>} : vector<8x64xi32>
    %11 = vector.broadcast %9 : vector<8x1xi32> to vector<8x64xi32>
    %12 = arith.cmpi eq, %11, %10 : vector<8x64xi32>
    %13 = arith.extui %12 : vector<8x64xi1> to vector<8x64xi32>
    %14 = arith.sitofp %13 : vector<8x64xi32> to vector<8x64xf32>
    %cst = arith.constant dense<0.000000e+00> : vector<8x32xf32>
    %15 = tpu.matmul %14, %0, %cst {dimension_numbers = #tpu.dot_dimension_numbers<[1], [0], [0], [1], [0, 0, 1, 1], [], []>} : vector<8x64xf32>, vector<64x32xf32>, vector<8x32xf32> -> vector<8x32xf32>
    %cst_7 = arith.constant dense<0.000000e+00> : vector<8x32xf32>
    %16 = tpu.matmul %15, %1, %cst_7 {dimension_numbers = #tpu.dot_dimension_numbers<[1], [0], [0], [1], [0, 0, 1, 1], [], []>} : vector<8x32xf32>, vector<32x32xf32>, vector<8x32xf32> -> vector<8x32xf32>
    %17 = vector.broadcast %3 : vector<1x32xf32> to vector<8x32xf32>
    %18 = arith.addf %16, %17 : vector<8x32xf32>
    %19 = arith.negf %18 : vector<8x32xf32>
    %20 = math.exp %19 : vector<8x32xf32>
    %cst_8 = arith.constant 1.000000e+00 : f32
    %21 = vector.broadcast %cst_8 : f32 to vector<8x32xf32>
    %22 = arith.addf %21, %20 : vector<8x32xf32>
    %23 = arith.divf %21, %22 : vector<8x32xf32>
    %24 = arith.mulf %18, %23 : vector<8x32xf32>
    %cst_9 = arith.constant dense<0.000000e+00> : vector<8x32xf32>
    %25 = tpu.matmul %24, %2, %cst_9 {dimension_numbers = #tpu.dot_dimension_numbers<[1], [0], [0], [1], [0, 0, 1, 1], [], []>} : vector<8x32xf32>, vector<32x32xf32>, vector<8x32xf32> -> vector<8x32xf32>
    %26 = vector.broadcast %4 : vector<1x32xf32> to vector<8x32xf32>
    %27 = arith.addf %25, %26 : vector<8x32xf32>
    %c0_10 = arith.constant 0 : index
    %c0_11 = arith.constant 0 : index
    %28 = vector.load %arg2[%c0_10, %c0_11] : memref<8x32xf32, #tpu.memory_space<vmem>>, vector<8x32xf32>
    tpu.vector_store %arg2[%c0_10, %c0_11], %27 {strides = array<i32>} : memref<8x32xf32, #tpu.memory_space<vmem>>, vector<8x32xf32>,
    return
  }
}

</mosaic_0001>

<bundles_post_ra>
// kernel: tpu_custom_call.1
= control target key start
LH: loop header
LB: loop body
LE: loop exit
PB: predicated region body
PF: predicated region fallthrough
CT: control target
= control target key end

     0   :  { %v419_v3 = vmov 0   ;;  %v420_v4 = vmov 0.0|0.0   ;;  %s514_s0 = inlined_call_operand.vmem [shape: s32[8,1], index: 0, kind: input, shape index: {}]   ;;  %s515_s1 = inlined_call_operand.vmem [shape: f32[144,32], index: 1, kind: input, shape index: {}]   ;;  %s516_s2 = inlined_call_operand.hbm [shape: f32[8,32], index: 2, kind: output, shape index: {}]  }
   0x1   :  { %v30_v0 = vld [vmem:[%s514_s0] sm:$0xff]  ;;  %v13_v2 = vld [vmem:[%s515_s1 + $0x8] sm:$0xff]  ;;  %390 = vset.pattern.permute.xlu0 %v419_v3  ;;  %361 = vmatprep.subr.bf16.mxu0 %v420_v4  ;;  %v14_v6 = vld [vmem:[%s515_s1 + $0x10] sm:$0xff] }
   0x2   :  { %v12_v1 = vld [vmem:[%s515_s1] sm:$0xff]  ;;  %vm31_vm0 = vcmp.gt.s32.totalorder %v30_v0, 0  ;;  %v15_v7 = vld [vmem:[%s515_s1 + $0x18] sm:$0xff]  ;;  %373 = vmatprep.subr.bf16.mxu1 %v420_v4 }
   0x3   :  { %v362_v5 = vpack.c.bf16 %v13_v2, %v12_v1  ;;  %v32_v8 = vsel %vm31_vm0, %v30_v0, 0  ;;  %v365_v9 = vpack.c.bf16 %v15_v7, %v14_v6 }
   0x4   :  { %vm33_vm1 = vcmp.lt.s32.totalorder %v32_v8, 63 }
   0x5   :  { %363 = vmatpush3.bf16.msra.mxu0 %v362_v5 }
   0x6   :  { %7 = vsyncpa [#allocation3], 0  ;;  %v34_v10 = vsel %vm33_vm1, %v32_v8, 63  ;;  %364 = vmatprep.subr.bf16.mxu0 %v420_v4  ;;  %v16_v11 = vld [vmem:[%s515_s1 + $0x20] sm:$0xff]  ;;  %v17_v12 = vld [vmem:[%s515_s1 + $0x28] sm:$0xff]  ;;  %vm421_vm2 = vmmov 0   ;;  %v35_v24 = vlaneseq }
   0x7   :  { %38 = vperm.xlu0 %390, %v34_v10   ;;  %v422_v13 = vmov 0.0   ;;  %v368_v14 = vpack.c.bf16 %v17_v12, %v16_v11  ;;  %v20_v15 = vld [vmem:[%s515_s1 + $0x40] sm:$0xff]  ;;  %v21_v16 = vld [vmem:[%s515_s1 + $0x48] sm:$0xff]  ;;  %v22_v17 = vld [vmem:[%s515_s1 + $0x50] sm:$0xff]  ;;  %vm43_vm3 = vcmask 523264   ;;  %vm121_vm5 = vcmask 261120  }
   0x8   :  { %336 = vmatprep.mubr.msk.f32.mxu0 %vm421_vm2, %v422_v13  ;;  %347 = vmatprep.mubr.msk.f32.mxu1 %vm421_vm2, %v422_v13  ;;  %v18_v18 = vld [vmem:[%s515_s1 + $0x30] sm:$0xff]  ;;  %v19_v19 = vld [vmem:[%s515_s1 + $0x38] sm:$0xff]  ;;  %v374_v20 = vpack.c.bf16 %v21_v16, %v20_v15  ;;  %v36_v25 = vand.u32 127, %v35_v24  ;;  %v24_v30 = vld [vmem:[%s515_s1 + $0x60] sm:$0xff]  ;;  %s423_s0 = smov [#allocation2]  }
   0x9   :  { %366 = vmatpush3.bf16.msra.mxu0 %v365_v9  ;;  %v23_v21 = vld [vmem:[%s515_s1 + $0x58] sm:$0xff]  ;;  %v371_v23 = vpack.c.bf16 %v19_v19, %v18_v18  ;;  %v25_v31 = vld [vmem:[%s515_s1 + $0x68] sm:$0xff]  ;;  %v26_v33 = vld [vmem:[%s515_s1 + $0x70] sm:$0xff]  ;;  %s286_s18 = sshll.u32 %s423_s0, 4  ;;  %s287_s18 = int_to_ptr.vmem [resolvable:$true] %s286_s18 }
   0xa   :  { %367 = vmatprep.subr.bf16.mxu0 %v420_v4  ;;  %375 = vmatpush3.bf16.msra.mxu1 %v374_v20  ;;  %v377_v22 = vpack.c.bf16 %v23_v21, %v22_v17  ;;  %v380_v32 = vpack.c.bf16 %v25_v31, %v24_v30  ;;  %v27_v34 = vld [vmem:[%s515_s1 + $0x78] sm:$0xff]  ;;  %v296_v36 = vld [vmem:[%s515_s1 + $0x80] ss:$0 sm:$0xff]  ;;  %v299_v45 = vld [vmem:[%s515_s1 + $0x88] ss:$0 sm:$0xff]  ;;  %s395_s19 = scalar_lea.vmem %s287_s18, 128  ;;  %p400_p1 = scmp.lt.s32.totalorder %s287_s18, %s287_s18 }
   0xb   :  { %376 = vmatprep.subr.bf16.mxu1 %v420_v4  ;;  %v383_v35 = vpack.c.bf16 %v27_v34, %v26_v33  ;;  %p396_p0 = scmp.ne.s32.totalorder %s287_s18, %s395_s19  ;;  %p401_p2 = scmp.lt.s32.totalorder %s395_s19, %s395_s19 }
   0xd   :  { %369 = vmatpush3.bf16.msra.mxu0 %v368_v14  ;;  %p402_p3 = por %p401_p2, %p400_p1 }
   0xe   :  { %370 = vmatprep.subr.bf16.mxu0 %v420_v4  ;;  %378 = vmatpush3.bf16.msra.mxu1 %v377_v22 }
   0xf   :  { %379 = vmatprep.subr.bf16.mxu1 %v420_v4  ;;  %p403_p4 = pnand %p402_p3, %p396_p0 }
  0x11   :  { %372 = vmatpush3.bf16.msra.mxu0 %v371_v23 }
  0x86   :  { %v39_v26 = vpop.permute.xlu0 %38 }
  0x87   :  { %vm40_vm4 = vcmp.eq.s32.totalorder %v39_v26, %v36_v25 }
  0x88   :  { %v294_v27 = vsel %vm40_vm4, 1.0, %v422_v13 }
  0x89   :  { %337 = vmatmul.mubr.msk.f32.vlgmr.msra.gmra.mrb[0].mxu0 %vm43_vm3, %v294_v27 }
 0x15c   :  { %v113_v28 = vpop.f32.mrb[0].mxu0 }
 0x15d   :  { %v338_v29 = vpop.f32.mrb[1].mxu0  ;;  %348 = vmatmul.mubr.msk.f32.vlgmr.msra.gmra.mrb[0].mxu1 %vm121_vm5, %v113_v28 }
 0x15e   :  { %358 = vmatprep.mubr.msk.f32.mxu1 %vm421_vm2, %v422_v13  ;;  %381 = vmatpush3.bf16.msra.mxu1 %v380_v32 }
 0x15f   :  { %382 = vmatprep.subr.bf16.mxu1 %v420_v4 }
 0x162   :  { %384 = vmatpush3.bf16.msra.mxu1 %v383_v35 }
 0x230   :  { %v191_v37 = vpop.f32.mrb[0].mxu1 }
 0x231   :  { %v192_v38 = vadd.f32 %v296_v36, %v191_v37  ;;  %v349_v39 = vpop.f32.mrb[1].mxu1 }
 0x233   :  { %v298_v40 = vmul.f32 -1.442695, %v192_v38 }
 0x235   :  { %391 = vpow2.f32 %v298_v40 }
 0x23f   :  { %v392_v41 = vpop.eup %391 }
 0x240   :  { %v198_v42 = vadd.f32 1.0, %v392_v41 }
 0x242   :  { %393 = vrcp.f32 %v198_v42 }
 0x24c   :  { %v394_v43 = vpop.eup %393 }
 0x24d   :  { %v201_v44 = vmul.f32 %v394_v43, %v192_v38 }
 0x24f   :  { %359 = vmatmul.mubr.msk.f32.vlgmr.msra.gmra.mrb[2].mxu1 %vm121_vm5, %v201_v44 }
 0x322   :  { %v275_v46 = vpop.f32.mrb[2].mxu1 }
 0x323   :  { %v276_v47 = vadd.f32 %v299_v45, %v275_v46  ;;  %v360_v48 = vpop.f32.mrb[3].mxu1 }
 0x325   :  { %279 = vst.msk [vmem:[#allocation2] sm:$0xff] %vm121_vm5, %v276_v47 }
 0x326   :  { %406 = shalt.err (!%p403_p4)
}
 0x327   :  { %s407_s22 = scalar_lea.hbm %s516_s2, 128 }
 0x328   :  { %p408_p5 = scmp.ne.s32.totalorder %s516_s2, %s407_s22  ;;  %p411_p6 = scmp.lt.u32.totalorder %s407_s22, %s516_s2 }
 0x32a   :  { %p413_p7 = pnand %p411_p6, %p408_p5 }
 0x32c   :  { %416 = shalt.err (!%p413_p7)
}
 0x32d   :  { %289 = dma.vmem_to_hbm [thread:$0]  %s287_s18, 128, %s516_s2, [#allocation3]  }
 0x32e   :  { %417 = dma.done.wait [#allocation3], 128  }
 0x32f   :  { %418 = vsyncadd [#allocation3], 4294967168 }
 0x330   :  { %293 = vsyncpa [#allocation3], 1 }

</bundles_post_ra>
